<compile_context>
chip_gen: v5e
topology: v5e:2x2
jax: 0.10.0
libtpu: 0.0.40
codegen_flags: <defaults>
</compile_context>

<pallas_src>
import functools

import jax
import jax.numpy as jnp
from jax.experimental import pallas as pl
from jax.experimental.pallas import tpu as pltpu


_BLOCK_BUDGET = 4 << 20     # ~4 MiB target block (near the roofline knee)
_MIN_BLOCK = 1 << 20        # don't shrink blocks below ~1 MiB just for step count
_CHUNK_FALLBACK = 8 << 20   # single-batch (C, HW) slab above this -> chunked path
_CHUNK_BUDGET = 2 << 20     # per-chunk block size in the fallback


# --------------------------------------------------------------------------- #
# In-kernel helpers
# --------------------------------------------------------------------------- #

def _pool_sum_f32(x):
    """Channel sums over the last (spatial) axis of a (Bt, C, S) block, in f32."""
    if x.dtype == jnp.float32:
        return jnp.sum(x, axis=-1)
    # bf16 / fp16: contract the spatial axis on the (otherwise idle) MXU with an
    # f32 accumulator instead of materializing a full f32 copy of the slab.
    bt, c, s = x.shape
    ones = jnp.ones((s, 1), dtype=x.dtype)
    y = jnp.dot(x.reshape(bt * c, s), ones, preferred_element_type=jnp.float32)
    return y.reshape(bt, c)


def _scale_from_sums(y, w1t_ref, b1_ref, w2t_ref, b2_ref):
    """(Bt, C) channel sums -> (Bt, C) sigmoid scales (1/HW is folded into w1t)."""
    h = jnp.dot(y, w1t_ref[...], preferred_element_type=jnp.float32) + b1_ref[...]
    h = jnp.maximum(h, 0.0)                                   # ReLU
    z = jnp.dot(h, w2t_ref[...], preferred_element_type=jnp.float32) + b2_ref[...]
    return 1.0 / (1.0 + jnp.exp(-z))                          # sigmoid (EUP exp)


# --------------------------------------------------------------------------- #
# Single-pass kernel: the whole (Bt, C, HW) slab fits in VMEM
# --------------------------------------------------------------------------- #

def _se_kernel(x_ref, w1t_ref, b1_ref, w2t_ref, b2_ref, o_ref):
    x = x_ref[...]                                            # (Bt, C, HW), native dtype
    y = _pool_sum_f32(x)                                      # (Bt, C) f32 sums
    s = _scale_from_sums(y, w1t_ref, b1_ref, w2t_ref, b2_ref) # (Bt, C) f32
    # Per-channel rescale, broadcast over spatial, in x's native dtype.
    o_ref[...] = (x * s[:, :, None].astype(x.dtype)).astype(o_ref.dtype)


# --------------------------------------------------------------------------- #
# Chunked fallback: huge C*HW slab (v7x 64 MiB VMEM guard), ~1.5x HBM traffic
# --------------------------------------------------------------------------- #

def _se_pool_scale_kernel(x_ref, w1t_ref, b1_ref, w2t_ref, b2_ref, s_ref,
                          acc_ref, *, hw):
    si = pl.program_id(1)

    @pl.when(si == 0)
    def _():
        acc_ref[...] = jnp.zeros_like(acc_ref)

    x = x_ref[...]                                            # (Bt, C, Ht)
    bt, c, ht = x.shape
    if hw % ht != 0:
        # Mask the out-of-range tail of the last spatial chunk so it does not
        # pollute the channel sums (only the spatial axis is a reduction axis;
        # garbage rows of a partial batch block stay confined to garbage rows).
        pos = si * ht + jax.lax.broadcasted_iota(jnp.int32, (bt, c, ht), 2)
        x = jnp.where(pos < hw, x, jnp.zeros_like(x))
    acc_ref[...] += _pool_sum_f32(x)

    @pl.when(si == pl.num_programs(1) - 1)
    def _():
        scale = _scale_from_sums(acc_ref[...], w1t_ref, b1_ref, w2t_ref, b2_ref)
        s_ref[...] = scale[:, :, None]                        # (Bt, C, 1)


def _se_rescale_kernel(x_ref, s_ref, o_ref):
    x = x_ref[...]                                            # (Bt, C, Ht)
    o_ref[...] = (x * s_ref[...].astype(x.dtype)).astype(o_ref.dtype)


def _se_layer_chunked(x_flat, w1t, b1r, w2t, b2r):
    B, C, HW = x_flat.shape
    Cr = w1t.shape[1]
    itemsize = jnp.dtype(x_flat.dtype).itemsize

    # Keep each chunk block around _CHUNK_BUDGET; Ht is a multiple of 128 (or
    # the full HW), so the last two block dims always satisfy the (8,128) rule
    # (C and the scale's trailing 1 use the full-array-dim exception).
    Bt = max(1, min(B, _CHUNK_BUDGET // (C * 128 * itemsize)))
    Ht = max(128, (_CHUNK_BUDGET // (Bt * C * itemsize)) // 128 * 128)
    if Ht >= HW:
        Ht = HW
    nb = pl.cdiv(B, Bt)
    ns = pl.cdiv(HW, Ht)

    pool_cost = pl.CostEstimate(
        flops=int(B * C * HW + 4 * B * C * Cr),
        transcendentals=int(B * C),
        bytes_accessed=int(B * C * HW * itemsize + B * C * 4),
    )
    scale = pl.pallas_call(
        functools.partial(_se_pool_scale_kernel, hw=HW),
        out_shape=jax.ShapeDtypeStruct((B, C, 1), jnp.float32),
        grid_spec=pltpu.PrefetchScalarGridSpec(
            num_scalar_prefetch=0,
            grid=(nb, ns),
            in_specs=[
                pl.BlockSpec((Bt, C, Ht), lambda b, s: (b, 0, s)),
                pl.BlockSpec((C, Cr), lambda b, s: (0, 0)),
                pl.BlockSpec((1, Cr), lambda b, s: (0, 0)),
                pl.BlockSpec((Cr, C), lambda b, s: (0, 0)),
                pl.BlockSpec((1, C), lambda b, s: (0, 0)),
            ],
            out_specs=pl.BlockSpec((Bt, C, 1), lambda b, s: (b, 0, 0)),
            scratch_shapes=[pltpu.VMEM((Bt, C), jnp.float32)],
        ),
        compiler_params=pltpu.CompilerParams(
            dimension_semantics=("parallel", "arbitrary"),
            vmem_limit_bytes=32 << 20,
        ),
        cost_estimate=pool_cost,
    )(x_flat, w1t, b1r, w2t, b2r)

    rescale_cost = pl.CostEstimate(
        flops=int(B * C * HW),
        transcendentals=0,
        bytes_accessed=int(2 * B * C * HW * itemsize + B * C * 4),
    )
    out_flat = pl.pallas_call(
        _se_rescale_kernel,
        out_shape=jax.ShapeDtypeStruct((B, C, HW), x_flat.dtype),
        grid_spec=pltpu.PrefetchScalarGridSpec(
            num_scalar_prefetch=0,
            grid=(nb, ns),
            in_specs=[
                pl.BlockSpec((Bt, C, Ht), lambda b, s: (b, 0, s)),
                pl.BlockSpec((Bt, C, 1), lambda b, s: (b, 0, 0)),
            ],
            out_specs=pl.BlockSpec((Bt, C, Ht), lambda b, s: (b, 0, s)),
        ),
        compiler_params=pltpu.CompilerParams(
            dimension_semantics=("parallel", "parallel"),
            vmem_limit_bytes=32 << 20,
        ),
        cost_estimate=rescale_cost,
    )(x_flat, scale)
    return out_flat


# --------------------------------------------------------------------------- #
# Public wrapper
# --------------------------------------------------------------------------- #

def se_layer(x, w1, b1, w2, b2, *, batch_tile=None, force_chunked=False):
    """SELayer forward.  x: (B, C, H, W); w1: (Cr, C), b1: (Cr,), w2: (C, Cr), b2: (C,)."""
    B, C, H, W = x.shape
    Cr = w1.shape[0]
    HW = H * W
    itemsize = jnp.dtype(x.dtype).itemsize

    x_flat = x.reshape(B, C, HW)

    # Fold the mean's 1/HW into the first conv weight in f32 (weights/biases
    # are tiny; the matmuls accumulate in f32 anyway).
    w1t = (w1.astype(jnp.float32) * (1.0 / HW)).T          # (C, Cr)
    w2t = w2.astype(jnp.float32).T                          # (Cr, C)
    b1r = b1.astype(jnp.float32).reshape(1, Cr)
    b2r = b2.astype(jnp.float32).reshape(1, C)

    per_batch_bytes = C * HW * itemsize

    # v7x (64 MiB VMEM) guard: a single-batch slab too big to double-buffer
    # comfortably goes through the HW-chunked two-kernel path.
    if force_chunked or per_batch_bytes > _CHUNK_FALLBACK:
        out_flat = _se_layer_chunked(x_flat, w1t, b1r, w2t, b2r)
        return out_flat.reshape(B, C, H, W)

    # --- batch-tiled single-pass path ---
    Bt = max(1, min(_BLOCK_BUDGET // per_batch_bytes, B))
    if B > 1:
        # Prefer >= 4 grid steps (2 per v7x TensorCore; >= 2 steps also lets the
        # DMA pipeline overlap on single-TC chips) while keeping blocks >= ~1 MiB.
        bt_steps = pl.cdiv(B, 4)
        bt_floor = pl.cdiv(_MIN_BLOCK, per_batch_bytes)
        Bt = min(Bt, max(bt_steps, bt_floor))
    if batch_tile is not None:
        Bt = batch_tile
    Bt = max(1, min(Bt, B))

    grid = (pl.cdiv(B, Bt),)   # no batch padding: the partial last block is masked
    block_bytes = Bt * per_batch_bytes
    vmem_limit = int(min(48 << 20, max(32 << 20, 5 * block_bytes + (4 << 20))))

    cost = pl.CostEstimate(
        flops=int(2 * B * C * HW + 4 * B * C * Cr),
        transcendentals=int(B * C),
        bytes_accessed=int(2 * B * C * HW * itemsize),
    )

    out_flat = pl.pallas_call(
        _se_kernel,
        out_shape=jax.ShapeDtypeStruct((B, C, HW), x.dtype),
        grid_spec=pltpu.PrefetchScalarGridSpec(
            num_scalar_prefetch=0,
            grid=grid,
            in_specs=[
                pl.BlockSpec((Bt, C, HW), lambda b: (b, 0, 0)),
                pl.BlockSpec((C, Cr), lambda b: (0, 0)),
                pl.BlockSpec((1, Cr), lambda b: (0, 0)),
                pl.BlockSpec((Cr, C), lambda b: (0, 0)),
                pl.BlockSpec((1, C), lambda b: (0, 0)),
            ],
            out_specs=pl.BlockSpec((Bt, C, HW), lambda b: (b, 0, 0)),
        ),
        compiler_params=pltpu.CompilerParams(
            dimension_semantics=("parallel",),
            vmem_limit_bytes=vmem_limit,
        ),
        cost_estimate=cost,
    )(x_flat, w1t, b1r, w2t, b2r)

    return out_flat.reshape(B, C, H, W)


def se_layer_ref(x, w1, b1, w2, b2):
    """Pure-JAX reference matching the PyTorch forward."""
    y = jnp.mean(x, axis=(2, 3))                         # (B, C)
    h = jnp.maximum(y @ w1.T + b1, 0.0)                  # (B, Cr)
    s = jax.nn.sigmoid(h @ w2.T + b2)                    # (B, C)
    return x * s[:, :, None, None]


# --------------------------------------------------------------------------- #
# Self-test
# --------------------------------------------------------------------------- #

if __name__ == "__main__":
    # Tolerance covers possible MXU f32 pass-precision differences between the
    # in-kernel dots and the XLA reference dots; real structural bugs are >>1e-2.
    ATOL = RTOL = 5e-3

    def make_params(key, C, reduction):
        Cr = max(1, C // reduction)
        k1, k2, k3, k4 = jax.random.split(key, 4)
        w1 = jax.random.normal(k1, (Cr, C), dtype=jnp.float32) * (1.0 / jnp.sqrt(C))
        b1 = jax.random.normal(k2, (Cr,), dtype=jnp.float32) * 0.01
        w2 = jax.random.normal(k3, (C, Cr), dtype=jnp.float32) * (1.0 / jnp.sqrt(Cr))
        b2 = jax.random.normal(k4, (C,), dtype=jnp.float32) * 0.01
        return w1, b1, w2, b2

    key = jax.random.PRNGKey(0)

    # 1) Main single-pass path: SELayer(channel=64, reduction=16), B=2, 16x16.
    kx, kp, key = jax.random.split(key, 3)
    x = jax.random.normal(kx, (2, 64, 16, 16), dtype=jnp.float32)
    w1, b1, w2, b2 = make_params(kp, 64, 16)
    out = jax.block_until_ready(se_layer(x, w1, b1, w2, b2))
    ref = se_layer_ref(x, w1, b1, w2, b2)
    assert out.shape == ref.shape == x.shape
    assert jnp.allclose(out, ref, atol=ATOL, rtol=RTOL), "main path mismatch"

    # 2) Ragged batch + odd spatial: exercises the un-padded partial batch block
    #    and the non-128-multiple spatial block (full-dim exception, masked tail).
    kx, kp, key = jax.random.split(key, 3)
    x = jax.random.normal(kx, (3, 64, 13, 13), dtype=jnp.float32)
    w1, b1, w2, b2 = make_params(kp, 64, 16)
    out = jax.block_until_ready(se_layer(x, w1, b1, w2, b2, batch_tile=2))
    ref = se_layer_ref(x, w1, b1, w2, b2)
    assert jnp.allclose(out, ref, atol=ATOL, rtol=RTOL), "ragged path mismatch"

    # 3) HW-chunked fallback (forced): exercises the v7x big-slab guard path,
    #    multi-chunk accumulation and the masked spatial tail.
    kx, kp, key = jax.random.split(key, 3)
    x = jax.random.normal(kx, (2, 512, 23, 23), dtype=jnp.float32)
    w1, b1, w2, b2 = make_params(kp, 512, 16)
    out = jax.block_until_ready(se_layer(x, w1, b1, w2, b2, force_chunked=True))
    ref = se_layer_ref(x, w1, b1, w2, b2)
    assert jnp.allclose(out, ref, atol=ATOL, rtol=RTOL), "chunked path mismatch"

    print("KERNEL_OK")
</pallas_src>

<mosaic_0001>
module attributes {stable_mosaic.version = 11 : i64} {
  func.func @_se_kernel(%arg0: i32, %arg1: memref<2x64x256xf32, #tpu.memory_space<vmem>>, %arg2: memref<64x4xf32, #tpu.memory_space<vmem>>, %arg3: memref<1x4xf32, #tpu.memory_space<vmem>>, %arg4: memref<4x64xf32, #tpu.memory_space<vmem>>, %arg5: memref<1x64xf32, #tpu.memory_space<vmem>>, %arg6: memref<2x64x256xf32, #tpu.memory_space<vmem>>) attributes {dimension_semantics = [#tpu.dimension_semantics<parallel>], iteration_bounds = array<i64: 1>, scalar_prefetch = 0 : i64, scratch_operands = 0 : i64, tpu.core_type = #tpu.core_type<tc>, window_params = [{transform_indices = @transform_0, window_bounds = array<i64: 2, 64, 256>}, {pipeline_mode = #tpu.pipeline_mode<synchronous>, transform_indices = @transform_1, window_bounds = array<i64: 64, 4>}, {pipeline_mode = #tpu.pipeline_mode<synchronous>, transform_indices = @transform_2, window_bounds = array<i64: 1, 4>}, {pipeline_mode = #tpu.pipeline_mode<synchronous>, transform_indices = @transform_3, window_bounds = array<i64: 4, 64>}, {pipeline_mode = #tpu.pipeline_mode<synchronous>, transform_indices = @transform_4, window_bounds = array<i64: 1, 64>}, {transform_indices = @transform_5, window_bounds = array<i64: 2, 64, 256>}]} {
    %c0 = arith.constant 0 : index
    %c0_0 = arith.constant 0 : index
    %c0_1 = arith.constant 0 : index
    %0 = vector.load %arg1[%c0, %c0_0, %c0_1] : memref<2x64x256xf32, #tpu.memory_space<vmem>>, vector<2x64x256xf32>
    %cst = arith.constant dense<0.000000e+00> : vector<2x64xf32>
    %1 = vector.multi_reduction <add>, %0, %cst [2] : vector<2x64x256xf32> to vector<2x64xf32>
    %c0_2 = arith.constant 0 : index
    %c0_3 = arith.constant 0 : index
    %2 = vector.load %arg2[%c0_2, %c0_3] : memref<64x4xf32, #tpu.memory_space<vmem>>, vector<64x4xf32>
    %cst_4 = arith.constant dense<0.000000e+00> : vector<2x4xf32>
    %3 = tpu.matmul %1, %2, %cst_4 {dimension_numbers = #tpu.dot_dimension_numbers<[1], [0], [0], [1], [0, 0, 1, 1], [], []>} : vector<2x64xf32>, vector<64x4xf32>, vector<2x4xf32> -> vector<2x4xf32>
    %c0_5 = arith.constant 0 : index
    %c0_6 = arith.constant 0 : index
    %4 = vector.load %arg3[%c0_5, %c0_6] : memref<1x4xf32, #tpu.memory_space<vmem>>, vector<1x4xf32>
    %5 = vector.broadcast %4 : vector<1x4xf32> to vector<2x4xf32>
    %6 = arith.addf %3, %5 : vector<2x4xf32>
    %cst_7 = arith.constant 0.000000e+00 : f32
    %7 = vector.broadcast %cst_7 : f32 to vector<2x4xf32>
    %8 = arith.maximumf %6, %7 : vector<2x4xf32>
    %c0_8 = arith.constant 0 : index
    %c0_9 = arith.constant 0 : index
    %9 = vector.load %arg4[%c0_8, %c0_9] : memref<4x64xf32, #tpu.memory_space<vmem>>, vector<4x64xf32>
    %cst_10 = arith.constant dense<0.000000e+00> : vector<2x64xf32>
    %10 = tpu.matmul %8, %9, %cst_10 {dimension_numbers = #tpu.dot_dimension_numbers<[1], [0], [0], [1], [0, 0, 1, 1], [], []>} : vector<2x4xf32>, vector<4x64xf32>, vector<2x64xf32> -> vector<2x64xf32>
    %c0_11 = arith.constant 0 : index
    %c0_12 = arith.constant 0 : index
    %11 = vector.load %arg5[%c0_11, %c0_12] : memref<1x64xf32, #tpu.memory_space<vmem>>, vector<1x64xf32>
    %12 = vector.broadcast %11 : vector<1x64xf32> to vector<2x64xf32>
    %13 = arith.addf %10, %12 : vector<2x64xf32>
    %cst_13 = arith.constant 0.000000e+00 : f32
    %14 = vector.broadcast %cst_13 : f32 to vector<2x64xf32>
    %15 = arith.subf %14, %13 : vector<2x64xf32>
    %16 = math.exp %15 : vector<2x64xf32>
    %cst_14 = arith.constant 1.000000e+00 : f32
    %17 = vector.broadcast %cst_14 : f32 to vector<2x64xf32>
    %18 = arith.addf %17, %16 : vector<2x64xf32>
    %cst_15 = arith.constant 1.000000e+00 : f32
    %19 = vector.broadcast %cst_15 : f32 to vector<2x64xf32>
    %20 = arith.divf %19, %18 : vector<2x64xf32>
    %21 = vector.shape_cast %20 : vector<2x64xf32> to vector<2x64x1xf32>
    %22 = vector.broadcast %21 : vector<2x64x1xf32> to vector<2x64x256xf32>
    %23 = arith.mulf %0, %22 : vector<2x64x256xf32>
    %c0_16 = arith.constant 0 : index
    %c0_17 = arith.constant 0 : index
    %c0_18 = arith.constant 0 : index
    %24 = vector.load %arg6[%c0_16, %c0_17, %c0_18] : memref<2x64x256xf32, #tpu.memory_space<vmem>>, vector<2x64x256xf32>
    tpu.vector_store %arg6[%c0_16, %c0_17, %c0_18], %23 {strides = array<i32>} : memref<2x64x256xf32, #tpu.memory_space<vmem>>, vector<2x64x256xf32>,
    return
  }
  func.func @transform_0(%arg0: i32) -> (i32, i32, i32) {
    %c0_i32 = arith.constant 0 : i32
    %c0_i32_0 = arith.constant 0 : i32
    %c0_i32_1 = arith.constant 0 : i32
    return %arg0, %c0_i32, %c0_i32_0 : i32, i32, i32
  }
  func.func @transform_1(%arg0: i32) -> (i32, i32) {
    %c0_i32 = arith.constant 0 : i32
    %c0_i32_0 = arith.constant 0 : i32
    %c0_i32_1 = arith.constant 0 : i32
    return %c0_i32, %c0_i32_0 : i32, i32
  }
  func.func @transform_2(%arg0: i32) -> (i32, i32) {
    %c0_i32 = arith.constant 0 : i32
    %c0_i32_0 = arith.constant 0 : i32
    %c0_i32_1 = arith.constant 0 : i32
    return %c0_i32, %c0_i32_0 : i32, i32
  }
  func.func @transform_3(%arg0: i32) -> (i32, i32) {
    %c0_i32 = arith.constant 0 : i32
    %c0_i32_0 = arith.constant 0 : i32
    %c0_i32_1 = arith.constant 0 : i32
    return %c0_i32, %c0_i32_0 : i32, i32
  }
  func.func @transform_4(%arg0: i32) -> (i32, i32) {
    %c0_i32 = arith.constant 0 : i32
    %c0_i32_0 = arith.constant 0 : i32
    %c0_i32_1 = arith.constant 0 : i32
    return %c0_i32, %c0_i32_0 : i32, i32
  }
  func.func @transform_5(%arg0: i32) -> (i32, i32, i32) {
    %c0_i32 = arith.constant 0 : i32
    %c0_i32_0 = arith.constant 0 : i32
    %c0_i32_1 = arith.constant 0 : i32
    return %arg0, %c0_i32, %c0_i32_0 : i32, i32, i32
  }
}

</mosaic_0001>

<bundles_post_ra>
// kernel: tpu_custom_call.1
= control target key start
LH: loop header
LB: loop body
LE: loop exit
PB: predicated region body
PF: predicated region fallthrough
CT: control target
= control target key end

     0   :  { %10 = vsyncpa [#allocation3], 0  ;;  %s745_s0 = inlined_call_operand.hbm [shape: f32[2,64,256], index: 0, kind: input, shape index: {}]   ;;  %s746_s1 = inlined_call_operand.vmem [shape: f32[64,4], index: 1, kind: input, shape index: {}]   ;;  %s747_s2 = inlined_call_operand.vmem [shape: f32[1,4], index: 2, kind: input, shape index: {}]   ;;  %s748_s3 = inlined_call_operand.vmem [shape: f32[4,64], index: 3, kind: input, shape index: {}]   ;;  %s749_s4 = inlined_call_operand.vmem [shape: f32[1,64], index: 4, kind: input, shape index: {}]   ;;  %s750_s5 = inlined_call_operand.hbm [shape: f32[2,64,256], index: 5, kind: output, shape index: {}]  }
   0x1   :  { %11 = vsyncpa [#allocation4], 0  ;;  %s16_s20 = sshll.u32 %s745_s0, 4  ;;  %s532_s21 = smov [#allocation2]   ;;  %s17_s20 = int_to_ptr.hbm [resolvable:$true] %s16_s20 }
   0x2   :  { %s18_s22 = sshll.u32 %s532_s21, 4  ;;  %s533_s23 = smov 256   ;;  %s19_s22 = int_to_ptr.vmem [resolvable:$true] %s18_s22 }
   0x3   :  { %s534_s24 = smov 16  }
   0x4   :  { %24 = dma.hbm_to_vmem [thread:$0]  %s17_s20, 4096, %s19_s22, [#allocation3], %s533_s23, %s533_s23, %s534_s24  }
   0x5   :  { %528 = dma.done.wait [#allocation3], 4096  }
   0x6   :  { %529 = vsyncadd [#allocation3], 4294963200  ;;  %v572_v0 = vld [vmem:[#allocation2 + $0x80] sm:$0xff]  ;;  %v574_v1 = vld [vmem:[#allocation2 + $0x88] sm:$0xff]  ;;  %vm150_vm0 = vcmask 130112   ;;  %vm154_vm1 = vcmask 195712  }
   0x7   :  { %v576_v2 = vld [vmem:[#allocation2] sm:$0xff]  ;;  %v93_v3 = vadd.f32 %v574_v1, %v572_v0  ;;  %v580_v4 = vld [vmem:[#allocation2 + $0x8] sm:$0xff]  ;;  %v590_v9 = vld [vmem:[#allocation2 + $0x90] sm:$0xff]  ;;  %vm158_vm2 = vcmask 261312   ;;  %vm162_vm3 = vcmask 326912   ;;  %vm166_vm4 = vcmask 392512  }
   0x8   :  { %v582_v5 = vld [vmem:[#allocation2 + $0x20] sm:$0xff]  ;;  %v584_v6 = vld [vmem:[#allocation2 + $0x28] sm:$0xff]  ;;  %v69_v7 = vadd.f32 %v580_v4, %v576_v2  ;;  %v592_v10 = vld [vmem:[#allocation2 + $0x98] sm:$0xff]  ;;  %vm170_vm5 = vcmask 458112   ;;  %vm174_vm6 = vcmask 523712   ;;  %vm191_vm7 = vcmask 1041409  }
   0x9   :  { %v75_v8 = vadd.f32 %v584_v6, %v582_v5  ;;  %94 = vadd.xlane.f32.xlu1 %v93_v3  ;;  %v594_v11 = vld [vmem:[#allocation2 + $0x10] sm:$0xff]  ;;  %v596_v12 = vld [vmem:[#allocation2 + $0x18] sm:$0xff]  ;;  %v598_v13 = vld [vmem:[#allocation2 + $0xa0] sm:$0xff]  ;;  %v96_v15 = vadd.f32 %v592_v10, %v590_v9  ;;  %vm193_vm8 = vcmask 523264   ;;  %vm226_vm9 = vcmask 1043456   ;;  %s437_s21 = sshll.u32 %s750_s5, 4  ;;  %s438_s21 = int_to_ptr.hbm [resolvable:$true] %s437_s21 }
   0xa   :  { %70 = vadd.xlane.f32.xlu0 %v69_v7  ;;  %v600_v14 = vld [vmem:[#allocation2 + $0xa8] sm:$0xff]  ;;  %v72_v16 = vadd.f32 %v596_v12, %v594_v11  ;;  %v608_v18 = vld [vmem:[#allocation2 + $0xb0] sm:$0xff]  ;;  %v610_v19 = vld [vmem:[#allocation2 + $0xb8] sm:$0xff]  ;;  %v751_v7 = vlaneseq  ;;  %vm222_vm10 = vcmask 31744  }
   0xb   :  { %76 = vadd.xlane.f32.xlu2 %v75_v8  ;;  %v99_v17 = vadd.f32 %v600_v14, %v598_v13  ;;  %v612_v20 = vld [vmem:[#allocation2 + $0x30] sm:$0xff]  ;;  %v614_v21 = vld [vmem:[#allocation2 + $0x38] sm:$0xff]  ;;  %v616_v22 = vld [vmem:[#allocation2 + $0x40] sm:$0xff]  ;;  %v102_v24 = vadd.f32 %v610_v19, %v608_v18 }
   0xc   :  { %v618_v23 = vld [vmem:[#allocation2 + $0x48] sm:$0xff]  ;;  %v78_v25 = vadd.f32 %v614_v21, %v612_v20  ;;  %v626_v27 = vld [vmem:[#allocation2 + $0x50] sm:$0xff]  ;;  %v628_v28 = vld [vmem:[#allocation2 + $0x58] sm:$0xff]  ;;  %v146_v8 = vand.u32 127, %v751_v7 }
   0xd   :  { %v81_v26 = vadd.f32 %v618_v23, %v616_v22  ;;  %v630_v29 = vld [vmem:[#allocation2 + $0xc0] sm:$0xff]  ;;  %v632_v30 = vld [vmem:[#allocation2 + $0xc8] sm:$0xff]  ;;  %v634_v31 = vld [vmem:[#allocation2 + $0xd0] sm:$0xff]  ;;  %v84_v33 = vadd.f32 %v628_v28, %v626_v27 }
   0xe   :  { %v636_v32 = vld [vmem:[#allocation2 + $0xd8] sm:$0xff]  ;;  %v105_v34 = vadd.f32 %v632_v30, %v630_v29  ;;  %v644_v36 = vld [vmem:[#allocation2 + $0xe0] sm:$0xff]  ;;  %v646_v37 = vld [vmem:[#allocation2 + $0xe8] sm:$0xff] }
   0xf   :  { %v108_v35 = vadd.f32 %v636_v32, %v634_v31  ;;  %v648_v38 = vld [vmem:[#allocation2 + $0x60] sm:$0xff]  ;;  %v650_v39 = vld [vmem:[#allocation2 + $0x68] sm:$0xff]  ;;  %v652_v40 = vld [vmem:[#allocation2 + $0x70] sm:$0xff]  ;;  %v111_v42 = vadd.f32 %v646_v37, %v644_v36 }
  0x10   :  { %v654_v41 = vld [vmem:[#allocation2 + $0x78] sm:$0xff]  ;;  %v87_v43 = vadd.f32 %v650_v39, %v648_v38  ;;  %v662_v45 = vld [vmem:[#allocation2 + $0xf0] sm:$0xff]  ;;  %v122_v53 = vld [vmem:[%s746_s1 + $0x28] sm:$0xff] }
  0x11   :  { %97 = vadd.xlane.f32.xlu1 %v96_v15  ;;  %v90_v44 = vadd.f32 %v654_v41, %v652_v40  ;;  %v664_v46 = vld [vmem:[#allocation2 + $0xf8] sm:$0xff]  ;;  %v123_v49 = vld [vmem:[%s746_s1 + $0x30] sm:$0xff]  ;;  %v121_v54 = vld [vmem:[%s746_s1 + $0x20] sm:$0xff]  ;;  %v148_v15 = vadd.s32 4294967288, %v146_v8 }
  0x12   :  { %73 = vadd.xlane.f32.xlu0 %v72_v16  ;;  %v114_v47 = vadd.f32 %v664_v46, %v662_v45  ;;  %v124_v48 = vld [vmem:[%s746_s1 + $0x38] sm:$0xff]  ;;  %v119_v56 = vld [vmem:[%s746_s1 + $0x10] sm:$0xff]  ;;  %v118_v60 = vld [vmem:[%s746_s1 + $0x8] sm:$0xff] }
  0x13   :  { %100 = vadd.xlane.f32.xlu2 %v99_v17  ;;  %204 = vmatpush.msra.mxu0 %v124_v48  ;;  %v120_v55 = vld [vmem:[%s746_s1 + $0x18] sm:$0xff]  ;;  %v117_v61 = vld [vmem:[%s746_s1] sm:$0xff] }
  0x15   :  { %205 = vmatpush.msra.mxu0 %v123_v49  ;;  %v164_v49 = vadd.s32 4294967256, %v146_v8 }
  0x17   :  { %206 = vmatpush.msra.mxu0 %v122_v53 }
  0x19   :  { %103 = vadd.xlane.f32.xlu1 %v102_v24  ;;  %207 = vmatpush.msra.mxu0 %v121_v54  ;;  %v152_v24 = vadd.s32 4294967280, %v146_v8  ;;  %v168_v54 = vadd.s32 4294967248, %v146_v8 }
  0x1a   :  { %79 = vadd.xlane.f32.xlu0 %v78_v25 }
  0x1b   :  { %82 = vadd.xlane.f32.xlu2 %v81_v26  ;;  %208 = vmatpush.msra.mxu0 %v120_v55 }
  0x1d   :  { %209 = vmatpush.msra.mxu0 %v119_v56 }
  0x1f   :  { %210 = vmatpush.msra.mxu0 %v118_v60 }
  0x21   :  { %85 = vadd.xlane.f32.xlu1 %v84_v33  ;;  %211 = vmatpush.msra.mxu0 %v117_v61  ;;  %v156_v33 = vadd.s32 4294967272, %v146_v8 }
  0x22   :  { %106 = vadd.xlane.f32.xlu0 %v105_v34 }
  0x23   :  { %109 = vadd.xlane.f32.xlu2 %v108_v35 }
  0x29   :  { %112 = vadd.xlane.f32.xlu1 %v111_v42 }
  0x2a   :  { %88 = vadd.xlane.f32.xlu0 %v87_v43 }
  0x2b   :  { %91 = vadd.xlane.f32.xlu2 %v90_v44  ;;  %v160_v44 = vadd.s32 4294967264, %v146_v8 }
  0x32   :  { %115 = vadd.xlane.f32.xlu0 %v114_v47 }
  0x7c   :  { %v95_v50 = vpop.xlane.xlu1 %94 }
  0x7d   :  { %v71_v51 = vpop.xlane.xlu0 %70  ;;  %v176_v34 = vperm.slane %v95_v50, %v146_v8 }
  0x7e   :  { %v77_v52 = vpop.xlane.xlu2 %76  ;;  %v147_v35 = vperm.slane %v71_v51, %v146_v8 }
  0x7f   :  { %v153_v43 = vperm.slane %v77_v52, %v152_v24 }
  0x84   :  { %v98_v57 = vpop.xlane.xlu1 %97 }
  0x85   :  { %v74_v58 = vpop.xlane.xlu0 %73  ;;  %v177_v42 = vperm.slane %v98_v57, %v148_v15  ;;  %v172_v57 = vadd.s32 4294967240, %v146_v8 }
  0x86   :  { %v101_v59 = vpop.xlane.xlu2 %100  ;;  %v149_v26 = vperm.slane %v74_v58, %v148_v15 }
  0x87   :  { %v179_v53 = vperm.slane %v101_v59, %v152_v24  ;;  %v178_v56 = vsel %vm150_vm0, %v177_v42, %v176_v34 }
  0x88   :  { %v151_v47 = vsel %vm150_vm0, %v149_v26, %v147_v35 }
  0x89   :  { %v155_v61 = vsel %vm154_vm1, %v153_v43, %v151_v47  ;;  %v180_v15 = vsel %vm154_vm1, %v179_v53, %v178_v56 }
  0x8c   :  { %v104_v62 = vpop.xlane.xlu1 %103 }
  0x8d   :  { %v80_v63 = vpop.xlane.xlu0 %79  ;;  %v181_v60 = vperm.slane %v104_v62, %v156_v33 }
  0x8e   :  { %v83_v3 = vpop.xlane.xlu2 %82  ;;  %v157_v48 = vperm.slane %v80_v63, %v156_v33 }
  0x8f   :  { %v161_v58 = vperm.slane %v83_v3, %v160_v44  ;;  %v182_v24 = vsel %vm158_vm2, %v181_v60, %v180_v15 }
  0x90   :  { %v159_v50 = vsel %vm158_vm2, %v157_v48, %v155_v61 }
  0x91   :  { %v163_v62 = vsel %vm162_vm3, %v161_v58, %v159_v50  ;;  %v475_v58 = vld [vmem:[%s749_s4] ss:$0 sm:$0xff] }
  0x94   :  { %v86_v17 = vpop.xlane.xlu1 %85 }
  0x95   :  { %v107_v16 = vpop.xlane.xlu0 %106  ;;  %v165_v51 = vperm.slane %v86_v17, %v164_v49 }
  0x96   :  { %v110_v25 = vpop.xlane.xlu2 %109  ;;  %v183_v7 = vperm.slane %v107_v16, %v160_v44 }
  0x97   :  { %v185_v26 = vperm.slane %v110_v25, %v164_v49  ;;  %v167_v3 = vsel %vm166_vm4, %v165_v51, %v163_v62  ;;  %v217_v25 = vld [vmem:[%s748_s3] sm:$0xf] }
  0x98   :  { %v184_v33 = vsel %vm162_vm3, %v183_v7, %v182_v24  ;;  %451 = vmatpush.msk.msra.mxu1 %vm226_vm9, %v217_v25  ;;  %v474_v7 = vld [vmem:[%s747_s2] ss:$0 sm:$0xff]  ;;  %s535_s2 = smov [#allocation5]  }
  0x99   :  { %v186_v17 = vsel %vm166_vm4, %v185_v26, %v184_v33  ;;  %s435_s4 = sshll.u32 %s535_s2, 4  ;;  %s436_s4 = int_to_ptr.vmem [resolvable:$true] %s435_s4 }
  0x9c   :  { %v113_v52 = vpop.xlane.xlu1 %112 }
  0x9d   :  { %v89_v55 = vpop.xlane.xlu0 %88  ;;  %v187_v34 = vperm.slane %v113_v52, %v168_v54 }
  0x9e   :  { %v169_v63 = vperm.slane %v89_v55, %v168_v54  ;;  %v92_v59 = vpop.xlane.xlu2 %91  ;;  %v752_v55 = vlaneseq }
  0x9f   :  { %v173_v16 = vperm.slane %v92_v59, %v172_v57  ;;  %v188_v8 = vsel %vm170_vm5, %v187_v34, %v186_v17 }
  0xa0   :  { %v171_v35 = vsel %vm170_vm5, %v169_v63, %v167_v3  ;;  %v271_v56 = vshrl.u32 %v752_v55, 7 }
  0xa1   :  { %v175_v44 = vsel %vm174_vm6, %v173_v16, %v171_v35 }
  0xa2   :  { %457 = vset.pattern.permute.xlu1 %v271_v56  ;;  %v284_v60 = vadd.s32 16, %v271_v56  ;;  %v278_v61 = vadd.s32 8, %v271_v56  ;;  %v314_v25 = vadd.s32 56, %v271_v56 }
  0xa4   :  { %459 = vset.pattern.permute.xlu0 %v284_v60  ;;  %458 = vset.pattern.permute.xlu2 %v278_v61 }
  0xa5   :  { %v116_v42 = vpop.xlane.xlu0 %115 }
  0xa6   :  { %v189_v43 = vperm.slane %v116_v42, %v172_v57 }
  0xa8   :  { %v190_v47 = vsel %vm174_vm6, %v189_v43, %v188_v8  ;;  %v290_v43 = vadd.s32 24, %v271_v56  ;;  %v296_v8 = vadd.s32 32, %v271_v56 }
  0xa9   :  { %v192_v48 = vsel %vm191_vm7, %v190_v47, %v175_v44  ;;  %v308_v47 = vadd.s32 48, %v271_v56 }
  0xaa   :  { %450 = vmatmul.msk.f32.vlgmr.msra.gmra.mxu0 %vm193_vm8, %v192_v48  ;;  %v302_v48 = vadd.s32 40, %v271_v56 }
 0x127   :  { %v213_v49 = vpop.f32.mrf.mxu0 }
 0x128   :  { %v214_v53 = vadd.f32 %v474_v7, %v213_v49 }
 0x12a   :  { %v216_v54 = vmax.f32 %v214_v53, 0.0 }
 0x12c   :  { %452 = vmatmul.msk.f32.vlgmr.msra.gmra.mxu1 %vm222_vm10, %v216_v54 }
 0x1a9   :  { %v247_v50 = vpop.f32.mrf.mxu1 }
 0x1aa   :  { %v248_v51 = vadd.f32 %v475_v58, %v247_v50 }
 0x1ac   :  { %v250_v52 = vsub.f32 0.0, %v248_v51 }
 0x1ae   :  { %v251_v57 = vmul.f32 1.442695, %v250_v52 }
 0x1b0   :  { %476 = vpow2.f32 %v251_v57 }
 0x1b6   :  { %v477_v15 = vpop.eup %476 }
 0x1b7   :  { %v253_v63 = vadd.f32 1.0, %v477_v15 }
 0x1b9   :  { %478 = vrcp.f32 %v253_v63  ;;  %v265_v62 = vand.u32 2147483648, %v253_v63  ;;  %v263_v34 = vand.u32 2147483647, %v253_v63  ;;  %vm259_vm12 = vweird.f32 %v253_v63 }
 0x1bb   :  { %v266_v16 = vor.u32 1.1754944e-38, %v265_v62  ;;  %vm264_vm14 = vcmp.eq.f32.partialorder %v263_v34, 8.507059e+37 }
 0x1bf   :  { %v479_v59 = vpop.eup %478 }
 0x1c0   :  { %v255_v24 = vmul.f32 %v479_v59, %v253_v63  ;;  %vm260_vm11 = vweird.f32 %v479_v59 }
 0x1c1   :  { %vm261_vm13 = vmor %vm259_vm12, %vm260_vm11 }
 0x1c2   :  { %v256_v26 = vsub.f32 1.0, %v255_v24 }
 0x1c4   :  { %v257_v33 = vmul.f32 %v479_v59, %v256_v26 }
 0x1c6   :  { %v258_v3 = vadd.f32 %v479_v59, %v257_v33 }
 0x1c8   :  { %v262_v35 = vsel %vm261_vm13, %v479_v59, %v258_v3 }
 0x1c9   :  { %v267_v42 = vsel %vm264_vm14, %v266_v16, %v262_v35 }
 0x1ca   :  { %v269_v17 = vperm.slane %v267_v42, 0  ;;  %v318_v44 = vperm.slane %v267_v42, 1 }
 0x1cc   :  { %286 = vperm.xlu0 %459, %v269_v17   ;;  %280 = vperm.xlu2 %458, %v269_v17  }
 0x1cd   :  { %274 = vperm.xlu1 %457, %v269_v17  }
 0x1d4   :  { %466 = vset.pattern.permute.xlu0 %v278_v61  ;;  %460 = vset.pattern.permute.xlu2 %v290_v43 }
 0x1d5   :  { %461 = vset.pattern.permute.xlu1 %v296_v8 }
 0x1dc   :  { %329 = vperm.xlu0 %466, %v318_v44   ;;  %292 = vperm.xlu2 %460, %v269_v17  }
 0x1dd   :  { %298 = vperm.xlu1 %461, %v269_v17  }
 0x1e4   :  { %471 = vset.pattern.permute.xlu0 %v308_v47  ;;  %462 = vset.pattern.permute.xlu2 %v302_v48 }
 0x1e5   :  { %463 = vset.pattern.permute.xlu1 %v308_v47 }
 0x1ec   :  { %359 = vperm.xlu0 %471, %v318_v44   ;;  %304 = vperm.xlu2 %462, %v269_v17  }
 0x1ed   :  { %310 = vperm.xlu1 %463, %v269_v17  }
 0x1f4   :  { %464 = vset.pattern.permute.xlu2 %v314_v25  ;;  %473 = vset.pattern.permute.xlu0 %v314_v25 }
 0x1f5   :  { %465 = vset.pattern.permute.xlu1 %v271_v56 }
 0x1fc   :  { %316 = vperm.xlu2 %464, %v269_v17  }
 0x1fd   :  { %323 = vperm.xlu1 %465, %v318_v44  }
 0x204   :  { %467 = vset.pattern.permute.xlu2 %v284_v60 }
 0x205   :  { %468 = vset.pattern.permute.xlu1 %v290_v43 }
 0x20c   :  { %335 = vperm.xlu2 %467, %v318_v44  }
 0x20d   :  { %341 = vperm.xlu1 %468, %v318_v44  }
 0x214   :  { %469 = vset.pattern.permute.xlu2 %v296_v8 }
 0x215   :  { %470 = vset.pattern.permute.xlu1 %v302_v48 }
 0x21c   :  { %347 = vperm.xlu2 %469, %v318_v44  }
 0x21d   :  { %353 = vperm.xlu1 %470, %v318_v44  }
 0x224   :  { %472 = vset.pattern.permute.xlu2 %v314_v25 }
 0x226   :  { %v281_v7 = vpop.permute.xlu2 %280 }
 0x227   :  { %v369_v49 = vmul.f32 %v281_v7, %v594_v11  ;;  %v370_v53 = vmul.f32 %v281_v7, %v596_v12 }
 0x229   :  { %401 = vst [vmem:[#allocation5 + $0x10] sm:$0xff] %v369_v49 }
 0x22a   :  { %402 = vst [vmem:[#allocation5 + $0x18] sm:$0xff] %v370_v53 }
 0x22c   :  { %365 = vperm.xlu2 %472, %v318_v44  }
 0x236   :  { %v293_v54 = vpop.permute.xlu2 %292 }
 0x237   :  { %v373_v55 = vmul.f32 %v293_v54, %v612_v20  ;;  %v374_v56 = vmul.f32 %v293_v54, %v614_v21 }
 0x239   :  { %405 = vst [vmem:[#allocation5 + $0x30] sm:$0xff] %v373_v55 }
 0x23a   :  { %406 = vst [vmem:[#allocation5 + $0x38] sm:$0xff] %v374_v56 }
 0x23e   :  { %v287_v60 = vpop.permute.xlu0 %286 }
 0x23f   :  { %v371_v61 = vmul.f32 %v287_v60, %v582_v5  ;;  %v372_v58 = vmul.f32 %v287_v60, %v584_v6  ;;  %v275_v50 = vpop.permute.xlu1 %274 }
 0x240   :  { %v367_v11 = vmul.f32 %v275_v50, %v576_v2  ;;  %v368_v12 = vmul.f32 %v275_v50, %v580_v4 }
 0x241   :  { %403 = vst [vmem:[#allocation5 + $0x20] sm:$0xff] %v371_v61 }
 0x242   :  { %404 = vst [vmem:[#allocation5 + $0x28] sm:$0xff] %v372_v58 }
 0x243   :  { %399 = vst [vmem:[#allocation5] sm:$0xff] %v367_v11 }
 0x244   :  { %400 = vst [vmem:[#allocation5 + $0x8] sm:$0xff] %v368_v12 }
 0x246   :  { %v305_v51 = vpop.permute.xlu2 %304 }
 0x247   :  { %v377_v20 = vmul.f32 %v305_v51, %v626_v27  ;;  %v378_v21 = vmul.f32 %v305_v51, %v628_v28 }
 0x249   :  { %409 = vst [vmem:[#allocation5 + $0x50] sm:$0xff] %v377_v20 }
 0x24a   :  { %410 = vst [vmem:[#allocation5 + $0x58] sm:$0xff] %v378_v21 }
 0x24e   :  { %v330_v52 = vpop.permute.xlu0 %329 }
 0x24f   :  { %v385_v5 = vmul.f32 %v330_v52, %v590_v9  ;;  %v386_v6 = vmul.f32 %v330_v52, %v592_v10  ;;  %v299_v57 = vpop.permute.xlu1 %298 }
 0x250   :  { %v375_v2 = vmul.f32 %v299_v57, %v616_v22  ;;  %v376_v4 = vmul.f32 %v299_v57, %v618_v23 }
 0x251   :  { %417 = vst [vmem:[#allocation5 + $0x90] sm:$0xff] %v385_v5 }
 0x252   :  { %418 = vst [vmem:[#allocation5 + $0x98] sm:$0xff] %v386_v6 }
 0x253   :  { %407 = vst [vmem:[#allocation5 + $0x40] sm:$0xff] %v375_v2 }
 0x254   :  { %408 = vst [vmem:[#allocation5 + $0x48] sm:$0xff] %v376_v4 }
 0x256   :  { %v317_v15 = vpop.permute.xlu2 %316 }
 0x257   :  { %v381_v27 = vmul.f32 %v317_v15, %v652_v40  ;;  %v382_v28 = vmul.f32 %v317_v15, %v654_v41 }
 0x259   :  { %413 = vst [vmem:[#allocation5 + $0x70] sm:$0xff] %v381_v27 }
 0x25a   :  { %414 = vst [vmem:[#allocation5 + $0x78] sm:$0xff] %v382_v28 }
 0x25e   :  { %v360_v63 = vpop.permute.xlu0 %359 }
 0x25f   :  { %v395_v9 = vmul.f32 %v360_v63, %v644_v36  ;;  %v396_v10 = vmul.f32 %v360_v63, %v646_v37  ;;  %v311_v59 = vpop.permute.xlu1 %310 }
 0x260   :  { %v379_v22 = vmul.f32 %v311_v59, %v648_v38  ;;  %v380_v23 = vmul.f32 %v311_v59, %v650_v39 }
 0x261   :  { %427 = vst [vmem:[#allocation5 + $0xe0] sm:$0xff] %v395_v9 }
 0x262   :  { %428 = vst [vmem:[#allocation5 + $0xe8] sm:$0xff] %v396_v10 }
 0x263   :  { %411 = vst [vmem:[#allocation5 + $0x60] sm:$0xff] %v379_v22 }
 0x264   :  { %412 = vst [vmem:[#allocation5 + $0x68] sm:$0xff] %v380_v23 }
 0x266   :  { %v336_v24 = vpop.permute.xlu2 %335 }
 0x267   :  { %v387_v40 = vmul.f32 %v336_v24, %v598_v13  ;;  %v388_v41 = vmul.f32 %v336_v24, %v600_v14 }
 0x269   :  { %419 = vst [vmem:[#allocation5 + $0xa0] sm:$0xff] %v387_v40 }
 0x26a   :  { %420 = vst [vmem:[#allocation5 + $0xa8] sm:$0xff] %v388_v41 }
 0x26f   :  { %v324_v26 = vpop.permute.xlu1 %323 }
 0x270   :  { %v383_v36 = vmul.f32 %v324_v26, %v572_v0  ;;  %v384_v37 = vmul.f32 %v324_v26, %v574_v1 }
 0x272   :  { %415 = vst [vmem:[#allocation5 + $0x80] sm:$0xff] %v383_v36 }
 0x273   :  { %416 = vst [vmem:[#allocation5 + $0x88] sm:$0xff] %v384_v37 }
 0x276   :  { %v348_v38 = vpop.permute.xlu2 %347 }
 0x277   :  { %v391_v39 = vmul.f32 %v348_v38, %v630_v29  ;;  %v392_v62 = vmul.f32 %v348_v38, %v632_v30 }
 0x279   :  { %423 = vst [vmem:[#allocation5 + $0xc0] sm:$0xff] %v391_v39 }
 0x27a   :  { %424 = vst [vmem:[#allocation5 + $0xc8] sm:$0xff] %v392_v62 }
 0x27f   :  { %v342_v33 = vpop.permute.xlu1 %341 }
 0x280   :  { %v389_v13 = vmul.f32 %v342_v33, %v608_v18  ;;  %v390_v14 = vmul.f32 %v342_v33, %v610_v19 }
 0x282   :  { %421 = vst [vmem:[#allocation5 + $0xb0] sm:$0xff] %v389_v13 }
 0x283   :  { %422 = vst [vmem:[#allocation5 + $0xb8] sm:$0xff] %v390_v14 }
 0x286   :  { %v366_v34 = vpop.permute.xlu2 %365 }
 0x287   :  { %v397_v0 = vmul.f32 %v366_v34, %v662_v45  ;;  %v398_v1 = vmul.f32 %v366_v34, %v664_v46 }
 0x289   :  { %429 = vst [vmem:[#allocation5 + $0xf0] sm:$0xff] %v397_v0 }
 0x28a   :  { %430 = vst [vmem:[#allocation5 + $0xf8] sm:$0xff] %v398_v1 }
 0x28f   :  { %v354_v29 = vpop.permute.xlu1 %353 }
 0x290   :  { %v393_v18 = vmul.f32 %v354_v29, %v634_v31  ;;  %v394_v19 = vmul.f32 %v354_v29, %v636_v32 }
 0x292   :  { %425 = vst [vmem:[#allocation5 + $0xd0] sm:$0xff] %v393_v18 }
 0x293   :  { %426 = vst [vmem:[#allocation5 + $0xd8] sm:$0xff] %v394_v19 }
 0x294   :  { %443 = dma.vmem_to_hbm [thread:$0]  %s436_s4, 4096, %s438_s21, [#allocation4], %s533_s23, %s533_s23, %s534_s24  }
 0x295   :  { %530 = dma.done.wait [#allocation4], 4096  }
 0x296   :  { %531 = vsyncadd [#allocation4], 4294963200 }
 0x297   :  { %448 = vsyncpa [#allocation3], 1 }
 0x298   :  { %449 = vsyncpa [#allocation4], 1 }

</bundles_post_ra>
